<compile_context>
chip_gen: v5e
topology: v5e:2x2
jax: 0.10.0
libtpu: 0.0.40
codegen_flags: <defaults>
</compile_context>

<pallas_src>
import jax
import jax.numpy as jnp
from jax.experimental import pallas as pl
from jax.experimental.pallas import tpu as pltpu

LANES = 128
SUBLANES = 8
MAX_TILE_ROWS = 2048   # (2048, 128) f32 block = 1 MiB per input per step
NUM_SHARDS = 2         # row-range split across TensorCores (v7x megacore)


def _round_up(x, m):
    return ((x + m - 1) // m) * m


def _flatten_rows(x):
    """Flatten any-shape array to a lane-dense (M, 128) slab.

    Free (pure reshape, no HBM copy) when x.size is a multiple of 128;
    otherwise pays a single jnp.pad (rare for image tensors)."""
    flat = jnp.ravel(x)
    n = flat.shape[0]
    n_pad = _round_up(n, LANES)
    if n_pad != n:
        # TODO(synk): non-128-aligned element counts still pay one pad copy.
        flat = jnp.pad(flat, (0, n_pad - n))
    return flat.reshape(-1, LANES), n


def _make_l1_kernel(n_pairs, n_rows, tile_rows, tiles_per_shard):
    """Builds a kernel accumulating per-pair sum|a-b| into (8,128) f32 blocks."""

    def kernel(*refs):
        in_refs = refs[: 2 * n_pairs]
        out_refs = refs[2 * n_pairs:]
        s = pl.program_id(0)      # shard ("parallel")
        i = pl.program_id(1)      # row-tile within shard ("arbitrary")

        @pl.when(i == 0)
        def _():
            for o in out_refs:
                o[...] = jnp.zeros_like(o)

        # Rows past the true end of the slab (partial last block, or a block
        # whose index was clamped in the index_map) contribute nothing.
        block_start = (s * tiles_per_shard + i) * tile_rows
        row_ids = jax.lax.broadcasted_iota(jnp.int32, (tile_rows, LANES), 0)
        mask = row_ids < (n_rows - block_start)

        for p in range(n_pairs):
            a = in_refs[2 * p][...].astype(jnp.float32)
            b = in_refs[2 * p + 1][...].astype(jnp.float32)
            d = jnp.where(mask, jnp.abs(a - b), 0.0)
            # Fold (tile_rows, 128) -> (8, 128) with pure VPU vreg adds; the
            # final cross-lane/sublane reduce happens once, outside the kernel.
            out_refs[p][...] += jnp.sum(
                d.reshape(tile_rows // SUBLANES, SUBLANES, LANES), axis=0)

    return kernel


def _l1_sums(pairs):
    """pairs: list of (a2d, b2d) sharing one (M, 128) shape.

    Returns list of f32 scalars sum|a - b| per pair, from one fused kernel."""
    n_pairs = len(pairs)
    m_rows = pairs[0][0].shape[0]

    tile_rows = min(MAX_TILE_ROWS, _round_up(m_rows, SUBLANES))
    num_tiles = -(-m_rows // tile_rows)
    num_shards = min(NUM_SHARDS, num_tiles)
    tiles_per_shard = -(-num_tiles // num_shards)
    max_block = num_tiles - 1

    def in_map(s, i):
        # Clamp so a fully out-of-range block re-reads the last block; the
        # in-kernel row mask zeroes its contribution.
        return (jnp.minimum(s * tiles_per_shard + i, max_block), 0)

    in_specs = []
    operands = []
    for a2, b2 in pairs:
        in_specs.append(pl.BlockSpec((tile_rows, LANES), in_map))
        in_specs.append(pl.BlockSpec((tile_rows, LANES), in_map))
        operands.extend((a2, b2))

    out_specs = tuple(
        pl.BlockSpec((None, SUBLANES, LANES), lambda s, i: (s, 0, 0))
        for _ in range(n_pairs))
    out_shape = tuple(
        jax.ShapeDtypeStruct((num_shards, SUBLANES, LANES), jnp.float32)
        for _ in range(n_pairs))

    kernel = _make_l1_kernel(n_pairs, m_rows, tile_rows, tiles_per_shard)

    outs = pl.pallas_call(
        kernel,
        out_shape=out_shape,
        grid=(num_shards, tiles_per_shard),
        in_specs=in_specs,
        out_specs=out_specs,
        compiler_params=pltpu.CompilerParams(
            dimension_semantics=("parallel", "arbitrary"),
            vmem_limit_bytes=32 * 1024 * 1024,
        ),
    )(*operands)
    if not isinstance(outs, (list, tuple)):
        outs = (outs,)
    # Tiny final reduce (num_shards * 1024 floats per domain) in JAX.
    return [jnp.sum(o) for o in outs]


def cycle_loss(real_A, recovered_A, real_B, recovered_B, lambda_cycle=10.0):
    """JAX/Pallas equivalent of CycleLoss.forward."""
    a2, n_a = _flatten_rows(recovered_A)
    ra2, _ = _flatten_rows(real_A)
    b2, n_b = _flatten_rows(recovered_B)
    rb2, _ = _flatten_rows(real_B)

    if a2.shape == b2.shape:
        # Common CycleGAN case: both domains share a shape -> one fused call.
        sum_a, sum_b = _l1_sums([(a2, ra2), (b2, rb2)])
    else:
        (sum_a,) = _l1_sums([(a2, ra2)])
        (sum_b,) = _l1_sums([(b2, rb2)])

    lam = jnp.float32(lambda_cycle)
    cycle_loss_A = (sum_a / jnp.float32(n_a)) * lam
    cycle_loss_B = (sum_b / jnp.float32(n_b)) * lam
    return {
        "cycle_loss_A": cycle_loss_A,
        "cycle_loss_B": cycle_loss_B,
        "total_cycle_loss": cycle_loss_A + cycle_loss_B,
    }


if __name__ == "__main__":
    key = jax.random.PRNGKey(0)
    k1, k2, k3, k4 = jax.random.split(key, 4)
    # NCHW images, small shapes: batch=2, channels=4, spatial=16
    shape = (2, 4, 16, 16)
    real_A = jax.random.normal(k1, shape, dtype=jnp.float32)
    recovered_A = jax.random.normal(k2, shape, dtype=jnp.float32)
    real_B = jax.random.normal(k3, shape, dtype=jnp.float32)
    recovered_B = jax.random.normal(k4, shape, dtype=jnp.float32)

    out = cycle_loss(real_A, recovered_A, real_B, recovered_B, lambda_cycle=10.0)
    jax.block_until_ready(out)

    # Sanity check against pure-JAX reference (L1Loss = mean abs diff).
    ref_A = jnp.mean(jnp.abs(recovered_A - real_A)) * 10.0
    ref_B = jnp.mean(jnp.abs(recovered_B - real_B)) * 10.0
    assert jnp.allclose(out["cycle_loss_A"], ref_A, rtol=1e-5, atol=1e-5)
    assert jnp.allclose(out["cycle_loss_B"], ref_B, rtol=1e-5, atol=1e-5)
    assert jnp.allclose(out["total_cycle_loss"], ref_A + ref_B, rtol=1e-5, atol=1e-5)

    print("KERNEL_OK")
</pallas_src>

<mosaic_0001>
module attributes {stable_mosaic.version = 11 : i64} {
  func.func @kernel(%arg0: i32, %arg1: i32, %arg2: memref<16x128xf32, #tpu.memory_space<vmem>>, %arg3: memref<16x128xf32, #tpu.memory_space<vmem>>, %arg4: memref<16x128xf32, #tpu.memory_space<vmem>>, %arg5: memref<16x128xf32, #tpu.memory_space<vmem>>, %arg6: memref<1x8x128xf32, #tpu.memory_space<vmem>>, %arg7: memref<1x8x128xf32, #tpu.memory_space<vmem>>) attributes {dimension_semantics = [#tpu.dimension_semantics<parallel>, #tpu.dimension_semantics<arbitrary>], iteration_bounds = array<i64: 1, 1>, scalar_prefetch = 0 : i64, scratch_operands = 0 : i64, tpu.core_type = #tpu.core_type<tc>, window_params = [{transform_indices = @transform_0, window_bounds = array<i64: 16, 128>}, {transform_indices = @transform_1, window_bounds = array<i64: 16, 128>}, {transform_indices = @transform_2, window_bounds = array<i64: 16, 128>}, {transform_indices = @transform_3, window_bounds = array<i64: 16, 128>}, {transform_indices = @transform_4, window_bounds = array<i64: 1, 8, 128>}, {transform_indices = @transform_5, window_bounds = array<i64: 1, 8, 128>}]} {
    %c0_i32 = arith.constant 0 : i32
    %0 = arith.cmpi eq, %arg1, %c0_i32 : i32
    %1 = arith.extui %0 : i1 to i32
    %c0_i32_0 = arith.constant 0 : i32
    %2 = arith.cmpi ne, %1, %c0_i32_0 : i32
    scf.if %2 {
      %cst_24 = arith.constant 0.000000e+00 : f32
      %38 = vector.broadcast %cst_24 : f32 to vector<8x128xf32>
      %c0_25 = arith.constant 0 : index
      %c0_26 = arith.constant 0 : index
      %c0_27 = arith.constant 0 : index
      %39 = vector.load %arg6[%c0_25, %c0_26, %c0_27] : memref<1x8x128xf32, #tpu.memory_space<vmem>>, vector<1x8x128xf32>
      %40 = vector.shape_cast %39 : vector<1x8x128xf32> to vector<8x128xf32>
      %41 = vector.shape_cast %38 : vector<8x128xf32> to vector<1x8x128xf32>
      tpu.vector_store %arg6[%c0_25, %c0_26, %c0_27], %41 {strides = array<i32>} : memref<1x8x128xf32, #tpu.memory_space<vmem>>, vector<1x8x128xf32>,
      %cst_28 = arith.constant 0.000000e+00 : f32
      %42 = vector.broadcast %cst_28 : f32 to vector<8x128xf32>
      %c0_29 = arith.constant 0 : index
      %c0_30 = arith.constant 0 : index
      %c0_31 = arith.constant 0 : index
      %43 = vector.load %arg7[%c0_29, %c0_30, %c0_31] : memref<1x8x128xf32, #tpu.memory_space<vmem>>, vector<1x8x128xf32>
      %44 = vector.shape_cast %43 : vector<1x8x128xf32> to vector<8x128xf32>
      %45 = vector.shape_cast %42 : vector<8x128xf32> to vector<1x8x128xf32>
      tpu.vector_store %arg7[%c0_29, %c0_30, %c0_31], %45 {strides = array<i32>} : memref<1x8x128xf32, #tpu.memory_space<vmem>>, vector<1x8x128xf32>,
    } else {
    }
    %c1_i32 = arith.constant 1 : i32
    %3 = arith.muli %arg0, %c1_i32 : i32
    %4 = arith.addi %3, %arg1 : i32
    %c16_i32 = arith.constant 16 : i32
    %5 = arith.muli %4, %c16_i32 : i32
    %6 = tpu.iota {dimensions = array<i32: 0>} : vector<16x128xi32>
    %c16_i32_1 = arith.constant 16 : i32
    %7 = arith.subi %c16_i32_1, %5 : i32
    %8 = vector.broadcast %7 : i32 to vector<16x128xi32>
    %9 = arith.cmpi slt, %6, %8 : vector<16x128xi32>
    %c0 = arith.constant 0 : index
    %c0_2 = arith.constant 0 : index
    %10 = vector.load %arg2[%c0, %c0_2] : memref<16x128xf32, #tpu.memory_space<vmem>>, vector<16x128xf32>
    %c0_3 = arith.constant 0 : index
    %c0_4 = arith.constant 0 : index
    %11 = vector.load %arg3[%c0_3, %c0_4] : memref<16x128xf32, #tpu.memory_space<vmem>>, vector<16x128xf32>
    %12 = arith.subf %10, %11 : vector<16x128xf32>
    %13 = math.absf %12 : vector<16x128xf32>
    %cst = arith.constant 0.000000e+00 : f32
    %14 = vector.broadcast %cst : f32 to vector<16x128xf32>
    %15 = arith.select %9, %13, %14 : vector<16x128xi1>, vector<16x128xf32>
    %c0_5 = arith.constant 0 : index
    %c0_6 = arith.constant 0 : index
    %c0_7 = arith.constant 0 : index
    %16 = vector.load %arg6[%c0_5, %c0_6, %c0_7] : memref<1x8x128xf32, #tpu.memory_space<vmem>>, vector<1x8x128xf32>
    %17 = vector.shape_cast %16 : vector<1x8x128xf32> to vector<8x128xf32>
    %18 = vector.shape_cast %15 : vector<16x128xf32> to vector<2x8x128xf32>
    %cst_8 = arith.constant dense<0.000000e+00> : vector<8x128xf32>
    %19 = vector.multi_reduction <add>, %18, %cst_8 [0] : vector<2x8x128xf32> to vector<8x128xf32>
    %20 = arith.addf %17, %19 : vector<8x128xf32>
    %c0_9 = arith.constant 0 : index
    %c0_10 = arith.constant 0 : index
    %c0_11 = arith.constant 0 : index
    %21 = vector.load %arg6[%c0_9, %c0_10, %c0_11] : memref<1x8x128xf32, #tpu.memory_space<vmem>>, vector<1x8x128xf32>
    %22 = vector.shape_cast %21 : vector<1x8x128xf32> to vector<8x128xf32>
    %23 = vector.shape_cast %20 : vector<8x128xf32> to vector<1x8x128xf32>
    tpu.vector_store %arg6[%c0_9, %c0_10, %c0_11], %23 {strides = array<i32>} : memref<1x8x128xf32, #tpu.memory_space<vmem>>, vector<1x8x128xf32>,
    %c0_12 = arith.constant 0 : index
    %c0_13 = arith.constant 0 : index
    %24 = vector.load %arg4[%c0_12, %c0_13] : memref<16x128xf32, #tpu.memory_space<vmem>>, vector<16x128xf32>
    %c0_14 = arith.constant 0 : index
    %c0_15 = arith.constant 0 : index
    %25 = vector.load %arg5[%c0_14, %c0_15] : memref<16x128xf32, #tpu.memory_space<vmem>>, vector<16x128xf32>
    %26 = arith.subf %24, %25 : vector<16x128xf32>
    %27 = math.absf %26 : vector<16x128xf32>
    %cst_16 = arith.constant 0.000000e+00 : f32
    %28 = vector.broadcast %cst_16 : f32 to vector<16x128xf32>
    %29 = arith.select %9, %27, %28 : vector<16x128xi1>, vector<16x128xf32>
    %c0_17 = arith.constant 0 : index
    %c0_18 = arith.constant 0 : index
    %c0_19 = arith.constant 0 : index
    %30 = vector.load %arg7[%c0_17, %c0_18, %c0_19] : memref<1x8x128xf32, #tpu.memory_space<vmem>>, vector<1x8x128xf32>
    %31 = vector.shape_cast %30 : vector<1x8x128xf32> to vector<8x128xf32>
    %32 = vector.shape_cast %29 : vector<16x128xf32> to vector<2x8x128xf32>
    %cst_20 = arith.constant dense<0.000000e+00> : vector<8x128xf32>
    %33 = vector.multi_reduction <add>, %32, %cst_20 [0] : vector<2x8x128xf32> to vector<8x128xf32>
    %34 = arith.addf %31, %33 : vector<8x128xf32>
    %c0_21 = arith.constant 0 : index
    %c0_22 = arith.constant 0 : index
    %c0_23 = arith.constant 0 : index
    %35 = vector.load %arg7[%c0_21, %c0_22, %c0_23] : memref<1x8x128xf32, #tpu.memory_space<vmem>>, vector<1x8x128xf32>
    %36 = vector.shape_cast %35 : vector<1x8x128xf32> to vector<8x128xf32>
    %37 = vector.shape_cast %34 : vector<8x128xf32> to vector<1x8x128xf32>
    tpu.vector_store %arg7[%c0_21, %c0_22, %c0_23], %37 {strides = array<i32>} : memref<1x8x128xf32, #tpu.memory_space<vmem>>, vector<1x8x128xf32>,
    return
  }
  func.func @transform_0(%arg0: i32, %arg1: i32) -> (i32, i32) {
    %c1_i32 = arith.constant 1 : i32
    %0 = arith.muli %arg0, %c1_i32 : i32
    %1 = arith.addi %0, %arg1 : i32
    %c0_i32 = arith.constant 0 : i32
    %2 = arith.minsi %1, %c0_i32 : i32
    %c0_i32_0 = arith.constant 0 : i32
    %c0_i32_1 = arith.constant 0 : i32
    return %2, %c0_i32_0 : i32, i32
  }
  func.func @transform_1(%arg0: i32, %arg1: i32) -> (i32, i32) {
    %c1_i32 = arith.constant 1 : i32
    %0 = arith.muli %arg0, %c1_i32 : i32
    %1 = arith.addi %0, %arg1 : i32
    %c0_i32 = arith.constant 0 : i32
    %2 = arith.minsi %1, %c0_i32 : i32
    %c0_i32_0 = arith.constant 0 : i32
    %c0_i32_1 = arith.constant 0 : i32
    return %2, %c0_i32_0 : i32, i32
  }
  func.func @transform_2(%arg0: i32, %arg1: i32) -> (i32, i32) {
    %c1_i32 = arith.constant 1 : i32
    %0 = arith.muli %arg0, %c1_i32 : i32
    %1 = arith.addi %0, %arg1 : i32
    %c0_i32 = arith.constant 0 : i32
    %2 = arith.minsi %1, %c0_i32 : i32
    %c0_i32_0 = arith.constant 0 : i32
    %c0_i32_1 = arith.constant 0 : i32
    return %2, %c0_i32_0 : i32, i32
  }
  func.func @transform_3(%arg0: i32, %arg1: i32) -> (i32, i32) {
    %c1_i32 = arith.constant 1 : i32
    %0 = arith.muli %arg0, %c1_i32 : i32
    %1 = arith.addi %0, %arg1 : i32
    %c0_i32 = arith.constant 0 : i32
    %2 = arith.minsi %1, %c0_i32 : i32
    %c0_i32_0 = arith.constant 0 : i32
    %c0_i32_1 = arith.constant 0 : i32
    return %2, %c0_i32_0 : i32, i32
  }
  func.func @transform_4(%arg0: i32, %arg1: i32) -> (i32, i32, i32) {
    %c0_i32 = arith.constant 0 : i32
    %c0_i32_0 = arith.constant 0 : i32
    %c0_i32_1 = arith.constant 0 : i32
    return %arg0, %c0_i32, %c0_i32_0 : i32, i32, i32
  }
  func.func @transform_5(%arg0: i32, %arg1: i32) -> (i32, i32, i32) {
    %c0_i32 = arith.constant 0 : i32
    %c0_i32_0 = arith.constant 0 : i32
    %c0_i32_1 = arith.constant 0 : i32
    return %arg0, %c0_i32, %c0_i32_0 : i32, i32, i32
  }
}

</mosaic_0001>

<bundles_post_ra>
// kernel: tpu_custom_call.1
= control target key start
LH: loop header
LB: loop body
LE: loop exit
PB: predicated region body
PF: predicated region fallthrough
CT: control target
= control target key end

     0   :  { %11 = vsyncpa [#allocation3], 0  ;;  %s429_s0 = inlined_call_operand.hbm [shape: f32[16,128], index: 0, kind: input, shape index: {}]   ;;  %s430_s1 = inlined_call_operand.hbm [shape: f32[16,128], index: 1, kind: input, shape index: {}]   ;;  %s431_s2 = inlined_call_operand.hbm [shape: f32[16,128], index: 2, kind: input, shape index: {}]   ;;  %s432_s3 = inlined_call_operand.hbm [shape: f32[16,128], index: 3, kind: input, shape index: {}]   ;;  %s433_s4 = inlined_call_operand.hbm [shape: f32[1,8,128], index: 4, kind: output, shape index: {0}]   ;;  %s434_s5 = inlined_call_operand.hbm [shape: f32[1,8,128], index: 5, kind: output, shape index: {1}]  }
   0x1   :  { %12 = vsyncpa [#allocation6], 0 }
   0x2   :  { %13 = vsyncpa [#allocation9], 0 }
   0x3   :  { %14 = vsyncpa [#allocation4], 0 }
   0x4   :  { %15 = vsyncpa [#allocation12], 0  ;;  %s45_s20 = sshll.u32 %s430_s1, 4  ;;  %s373_s21 = smov [#allocation5]   ;;  %s46_s20 = int_to_ptr.hbm [resolvable:$true] %s45_s20 }
   0x5   :  { %s47_s22 = sshll.u32 %s373_s21, 4  ;;  %s26_s25 = sshll.u32 %s429_s0, 4  ;;  %s48_s22 = int_to_ptr.vmem [resolvable:$true] %s47_s22  ;;  %s27_s25 = int_to_ptr.hbm [resolvable:$true] %s26_s25 }
   0x6   :  { %s374_s26 = smov 128   ;;  %s375_s27 = smov 8  }
   0x7   :  { %53 = dma.hbm_to_vmem [thread:$0]  %s46_s20, 256, %s48_s22, [#allocation6], %s374_s26, %s374_s26, %s375_s27  }
   0x8   :  { %s376_s28 = smov [#allocation2]   ;;  %s64_s7 = sshll.u32 %s431_s2, 4  ;;  %s65_s7 = int_to_ptr.hbm [resolvable:$true] %s64_s7 }
   0x9   :  { %s28_s29 = sshll.u32 %s376_s28, 4  ;;  %s83_s9 = sshll.u32 %s432_s3, 4  ;;  %s29_s29 = int_to_ptr.vmem [resolvable:$true] %s28_s29  ;;  %s84_s9 = int_to_ptr.hbm [resolvable:$true] %s83_s9 }
   0xa   :  { %34 = dma.hbm_to_vmem [thread:$0]  %s27_s25, 256, %s29_s29, [#allocation3], %s374_s26, %s374_s26, %s375_s27  }
   0xb   :  { %s377_s10 = smov [#allocation7]   ;;  %s378_s0 = smov [#allocation8]  }
   0xc   :  { %s66_s11 = sshll.u32 %s377_s10, 4  ;;  %s85_s12 = sshll.u32 %s378_s0, 4  ;;  %s67_s11 = int_to_ptr.vmem [resolvable:$true] %s66_s11  ;;  %s86_s12 = int_to_ptr.vmem [resolvable:$true] %s85_s12 }
   0xd   :  { %72 = dma.hbm_to_vmem [thread:$0]  %s65_s7, 256, %s67_s11, [#allocation6], %s374_s26, %s374_s26, %s375_s27  }
   0xe   :  { %91 = dma.hbm_to_vmem [thread:$0]  %s84_s9, 256, %s86_s12, [#allocation9], %s374_s26, %s374_s26, %s375_s27  }
   0xf   :  { %363 = dma.done.wait [#allocation3], 256  }
  0x10   :  { %364 = vsyncadd [#allocation3], 4294967040 }
  0x11   :  { %365 = dma.done.wait [#allocation6], 512  }
  0x12   :  { %366 = vsyncadd [#allocation6], 4294966784 }
  0x13   :  { %367 = dma.done.wait [#allocation9], 256  }
  0x14   :  { %368 = vsyncadd [#allocation9], 4294967040  ;;  %v139_v0 = vld [vmem:[#allocation2] sm:$0xff]  ;;  %v140_v1 = vld [vmem:[#allocation2 + $0x8] sm:$0xff]  ;;  %s379_s2 = smov [#allocation10]   ;;  %s174_s15 = sshll.u32 %s433_s4, 4  ;;  %s175_s15 = int_to_ptr.hbm [resolvable:$true] %s174_s15 }
  0x15   :  { %v141_v2 = vld [vmem:[#allocation5] sm:$0xff]  ;;  %v142_v3 = vld [vmem:[#allocation5 + $0x8] sm:$0xff]  ;;  %v153_v5 = vld [vmem:[#allocation7] sm:$0xff]  ;;  %s172_s3 = sshll.u32 %s379_s2, 4  ;;  %s380_s16 = smov [#allocation11]   ;;  %s173_s3 = int_to_ptr.vmem [resolvable:$true] %s172_s3 }
  0x16   :  { %v143_v4 = vsub.f32 %v139_v0, %v141_v2  ;;  %v154_v6 = vld [vmem:[#allocation7 + $0x8] sm:$0xff]  ;;  %v144_v7 = vsub.f32 %v140_v1, %v142_v3  ;;  %v155_v8 = vld [vmem:[#allocation8] sm:$0xff]  ;;  %v156_v9 = vld [vmem:[#allocation8 + $0x8] sm:$0xff]  ;;  %s183_s17 = sshll.u32 %s380_s16, 4  ;;  %s185_s20 = sshll.u32 %s434_s5, 4  ;;  %s184_s17 = int_to_ptr.vmem [resolvable:$true] %s183_s17  ;;  %s186_s20 = int_to_ptr.hbm [resolvable:$true] %s185_s20 }
  0x17   :  { %v157_v11 = vsub.f32 %v153_v5, %v155_v8  ;;  %v158_v12 = vsub.f32 %v154_v6, %v156_v9 }
  0x18   :  { %v145_v10 = vand.u32 2147483647, %v143_v4  ;;  %v146_v13 = vand.u32 2147483647, %v144_v7 }
  0x19   :  { %v159_v14 = vand.u32 2147483647, %v157_v11  ;;  %v160_v15 = vand.u32 2147483647, %v158_v12 }
  0x1a   :  { %v150_v16 = vadd.f32 %v146_v13, %v145_v10 }
  0x1b   :  { %v164_v17 = vadd.f32 %v160_v15, %v159_v14 }
  0x1c   :  { %152 = vst [vmem:[#allocation10] sm:$0xff] %v150_v16 }
  0x1d   :  { %166 = vst [vmem:[#allocation11] sm:$0xff] %v164_v17  ;;  %177 = dma.vmem_to_hbm [thread:$0]  %s173_s3, 128, %s175_s15, [#allocation4]  }
  0x1e   :  { %188 = dma.vmem_to_hbm [thread:$0]  %s184_s17, 128, %s186_s20, [#allocation12]  }
  0x1f   :  { %369 = dma.done.wait [#allocation4], 128  }
  0x20   :  { %370 = vsyncadd [#allocation4], 4294967168 }
  0x21   :  { %371 = dma.done.wait [#allocation12], 128  }
  0x22   :  { %372 = vsyncadd [#allocation12], 4294967168 }
  0x23   :  { %197 = vsyncpa [#allocation3], 1 }
  0x24   :  { %198 = vsyncpa [#allocation6], 1 }
  0x25   :  { %199 = vsyncpa [#allocation9], 1 }
  0x26   :  { %200 = vsyncpa [#allocation4], 1 }
  0x27   :  { %201 = vsyncpa [#allocation12], 1 }

</bundles_post_ra>
